<compile_context>
chip_gen: v6e
topology: v6e:2x2x1
jax: 0.10.0
libtpu: 0.0.40
codegen_flags: <defaults>
</compile_context>

<pallas_src>
import functools
import math

import jax
import jax.numpy as jnp
from jax.experimental import pallas as pl
from jax.experimental.pallas import tpu as pltpu


# ---------------------------------------------------------------------------
# Fused sin/cos with a shared range reduction (float32).
# ---------------------------------------------------------------------------
_TWO_OVER_PI = 0.6366197723675814
# pi/2 split into exactly-representable float32 pieces (SLEEF/cephes style).
_PI2_A = 1.5703125
_PI2_B = 4.83512878417968750e-4
_PI2_C = 3.13855707645416259765625e-7
_PI2_D = 6.077100628276710381e-11


def _fused_sincos_f32(x):
    """Returns (sin(x), cos(x)) in float32, sharing one range reduction."""
    xf = x.astype(jnp.float32)
    q = jnp.floor(xf * _TWO_OVER_PI + 0.5)           # nearest quadrant count
    r = xf - q * _PI2_A
    r = r - q * _PI2_B
    r = r - q * _PI2_C
    r = r - q * _PI2_D                                # r in ~[-pi/4, pi/4]
    r2 = r * r
    # sin polynomial (cephes sinf coefficients)
    ps = jnp.float32(-1.9515295891e-4)
    ps = ps * r2 + jnp.float32(8.3321608736e-3)
    ps = ps * r2 + jnp.float32(-1.6666654611e-1)
    sin_r = r + r * r2 * ps
    # cos polynomial (cephes cosf coefficients)
    pc = jnp.float32(2.443315711809948e-5)
    pc = pc * r2 + jnp.float32(-1.388731625493765e-3)
    pc = pc * r2 + jnp.float32(4.166664568298827e-2)
    cos_r = 1.0 - 0.5 * r2 + r2 * r2 * pc
    # Quadrant fix-up (swap + sign), shared by both outputs.
    n = q.astype(jnp.int32)
    swap = (n & 1) != 0
    neg_s = (n & 2) != 0
    neg_c = ((n + 1) & 2) != 0
    s = jnp.where(swap, cos_r, sin_r)
    c = jnp.where(swap, sin_r, cos_r)
    s = jnp.where(neg_s, -s, s)
    c = jnp.where(neg_c, -c, c)
    return s, c


def _sincos_vals(x, fused):
    if fused:
        s, c = _fused_sincos_f32(x)
        return s.astype(x.dtype), c.astype(x.dtype)
    return jnp.sin(x), jnp.cos(x)


def _interleave(s, c, k, d):
    """Assemble the folded output row: [sin_0|cos_0|sin_1|cos_1|...]."""
    if k == 1:
        return jnp.concatenate([s, c], axis=-1)
    pieces = []
    for j in range(k):
        pieces.append(s[:, j * d:(j + 1) * d])
        pieces.append(c[:, j * d:(j + 1) * d])
    return jnp.concatenate(pieces, axis=-1)


# ---------------------------------------------------------------------------
# Kernels
# ---------------------------------------------------------------------------
def _sincos_kernel(x_ref, o_ref, *, k, d, aligned, fused):
    x = x_ref[...]
    s, c = _sincos_vals(x, fused)
    if aligned:                      # k == 1 and d % 128 == 0: aligned halves
        o_ref[:, :d] = s.astype(o_ref.dtype)
        o_ref[:, d:] = c.astype(o_ref.dtype)
    else:                            # one dense full-block store
        o_ref[...] = _interleave(s, c, k, d).astype(o_ref.dtype)


def _sincos_scaled_kernel(x_ref, scale_ref, o_ref, *, k, d, aligned, fused):
    x = x_ref[...]
    s, c = _sincos_vals(x, fused)
    w = k * d
    if aligned:
        o_ref[:, :w] = s.astype(o_ref.dtype) * scale_ref[:, :w]
        o_ref[:, w:] = c.astype(o_ref.dtype) * scale_ref[:, w:]
    else:
        o_ref[...] = _interleave(s, c, k, d).astype(o_ref.dtype) * scale_ref[...]


# ---------------------------------------------------------------------------
# Wrapper helpers
# ---------------------------------------------------------------------------
def _round_up(x, m):
    return ((x + m - 1) // m) * m


def _cdiv(a, b):
    return -(-a // b)


def _fold_factor(m, d, max_k=8):
    """Smallest k with (k*d) % 128 == 0, if it divides m and is small."""
    if d <= 0 or d % 128 == 0:
        return 1
    k = 128 // math.gcd(d, 128)
    if k > max_k or m % k != 0:
        return 1
    return k


def _vmem_limit_bytes():
    """64 MiB scoped VMEM on 128-MiB chips (v5e/v6e), 32 MiB on v7x/unknown."""
    try:
        cap = getattr(pltpu.get_tpu_info(), "vmem_capacity_bytes", None)
        if cap is not None and int(cap) >= 100 * 1024 * 1024:
            return 64 * 1024 * 1024
    except Exception:
        pass
    return 32 * 1024 * 1024


def _pick_row_tile(m_rows, w, in_itemsize, out_itemsize, vmem_limit, tm=None):
    pack = max(8, 32 // int(min(in_itemsize, out_itemsize)))  # sublane packing
    if tm is None:
        target_block_bytes = max(vmem_limit // 20, 256 * 1024)
        tm = target_block_bytes // max(int(w) * int(in_itemsize), 1)
        tm = max(pack, (tm // pack) * pack)
    if tm >= m_rows:
        tm = m_rows                   # full extent is always a legal block dim
    else:
        tm = max(pack, (tm // pack) * pack)
    # Split single-step grids on moderate inputs so both v7x TensorCores work.
    if tm == m_rows and m_rows >= 2 * pack and m_rows * w >= 32768:
        half = _round_up(_cdiv(m_rows, 2), pack)
        if half < m_rows:
            tm = half
    return int(tm)


def _scale_is_row(shape, two_d):
    """True if `shape` broadcasts to a single (2*D,) feature row."""
    if len(shape) == 0:
        return True
    if any(s != 1 for s in shape[:-1]):
        return False
    return shape[-1] in (1, two_d)


# ---------------------------------------------------------------------------
# Public entry point
# ---------------------------------------------------------------------------
def sine_cosine_transform(values, scale=None, *, tm=None, fused_sincos=True):
    """JAX/Pallas equivalent of SineCosineTransform.forward."""
    values = jnp.asarray(values)
    orig_shape = values.shape
    d = orig_shape[-1]
    lead = orig_shape[:-1]
    m = int(math.prod(lead))
    out_logical = (*lead, 2 * d)

    # ---- scale handling (PyTorch-style promotion & broadcasting) ----------
    post_scale = None
    scale_row = None
    scale_block = None
    scale_arr = None
    if scale is None:
        out_dtype = values.dtype
    else:
        if isinstance(scale, (bool, int, float)):
            scale_arr = jnp.asarray(scale, values.dtype)     # weak python scalar
        else:
            scale_arr = jnp.asarray(scale)
        out_dtype = jnp.promote_types(values.dtype, scale_arr.dtype)
        scale_arr = scale_arr.astype(out_dtype)
        bshape = tuple(jnp.broadcast_shapes(tuple(scale_arr.shape), out_logical))
        if bshape != out_logical:
            post_scale = scale_arr       # broadcast enlarges output: apply after
        elif _scale_is_row(scale_arr.shape, 2 * d):
            scale_row = jnp.broadcast_to(scale_arr.reshape(-1), (2 * d,))
        else:
            scale_block = jnp.broadcast_to(scale_arr, out_logical).reshape(m, 2 * d)

    # ---- degenerate sizes: plain jnp ---------------------------------------
    if m == 0 or d == 0:
        sincos = jnp.concatenate([jnp.sin(values), jnp.cos(values)], axis=-1)
        if scale is None:
            return sincos
        return scale_arr * sincos.astype(out_dtype)

    # ---- lane-dense row folding --------------------------------------------
    k = _fold_factor(m, d)
    w = k * d
    m_rows = m // k
    aligned = (k == 1) and (d % 128 == 0)
    x2 = values.reshape(m_rows, w)

    in_itemsize = values.dtype.itemsize
    out_itemsize = jnp.dtype(out_dtype).itemsize
    vmem_limit = _vmem_limit_bytes()
    tm = _pick_row_tile(m_rows, w, in_itemsize, out_itemsize, vmem_limit, tm)
    grid = (_cdiv(m_rows, tm),)

    x_spec = pl.BlockSpec((tm, w), lambda i: (i, 0))
    o_spec = pl.BlockSpec((tm, 2 * w), lambda i: (i, 0))
    out_shape = jax.ShapeDtypeStruct((m_rows, 2 * w), out_dtype)

    static = dict(k=k, d=d, aligned=aligned, fused=fused_sincos)
    if scale_row is not None:
        kernel = functools.partial(_sincos_scaled_kernel, **static)
        in_specs = [x_spec, pl.BlockSpec((1, 2 * w), lambda i: (0, 0))]
        operands = (x2, jnp.tile(scale_row, k).reshape(1, 2 * w))
        scale_bytes = 2 * w * out_itemsize
    elif scale_block is not None:
        kernel = functools.partial(_sincos_scaled_kernel, **static)
        in_specs = [x_spec, pl.BlockSpec((tm, 2 * w), lambda i: (i, 0))]
        operands = (x2, scale_block.reshape(m_rows, 2 * w))
        scale_bytes = m * 2 * d * out_itemsize
    else:
        kernel = functools.partial(_sincos_kernel, **static)
        in_specs = [x_spec]
        operands = (x2,)
        scale_bytes = 0

    n_elems = m * d
    cost = pl.CostEstimate(
        flops=(80 * n_elems) if fused_sincos else (4 * n_elems),
        transcendentals=0 if fused_sincos else 2 * n_elems,
        bytes_accessed=n_elems * in_itemsize + 2 * n_elems * out_itemsize
        + scale_bytes,
    )

    out2 = pl.pallas_call(
        kernel,
        out_shape=out_shape,
        grid_spec=pltpu.PrefetchScalarGridSpec(
            num_scalar_prefetch=0,
            grid=grid,
            in_specs=in_specs,
            out_specs=o_spec,
        ),
        compiler_params=pltpu.CompilerParams(
            dimension_semantics=("parallel",),
            vmem_limit_bytes=vmem_limit,
        ),
        cost_estimate=cost,
    )(*operands)

    out = out2.reshape(out_logical)
    if post_scale is not None:
        out = post_scale * out
    return out


if __name__ == "__main__":
    key = jax.random.PRNGKey(0)
    k1, k2, k3, k4 = jax.random.split(key, 4)

    def ref_fn(v, s=None):
        sc = jnp.concatenate([jnp.sin(v), jnp.cos(v)], axis=-1)
        return sc if s is None else s * sc

    # Small shapes consistent with the module: batch=2, seq=8, hidden=32.
    B, S, D = 2, 8, 32
    x = jax.random.normal(k1, (B, S, D), dtype=jnp.float32)
    scale = 0.5 + 0.1 * jnp.arange(2 * D, dtype=jnp.float32)

    # (2*D,) feature scale -> fused row scale, folded lane-dense path (k=4).
    out = jax.block_until_ready(sine_cosine_transform(x, scale))
    assert out.shape == (B, S, 2 * D)
    assert jnp.allclose(out, ref_fn(x, scale), atol=1e-5, rtol=1e-5)

    # scale=None -> leaner unscaled kernel.
    out_ns = jax.block_until_ready(sine_cosine_transform(x, None))
    assert jnp.allclose(out_ns, ref_fn(x), atol=1e-5, rtol=1e-5)

    # Scalar python-float scale (fused in-kernel, same compiled kernel).
    out_sc = jax.block_until_ready(sine_cosine_transform(x, 2.0))
    assert jnp.allclose(out_sc, 2.0 * ref_fn(x), atol=1e-5, rtol=1e-5)

    # Row count not divisible by the fold factor -> unfolded (masked) path.
    x2 = jax.random.normal(k2, (3, 5, D), dtype=jnp.float32)
    out2 = jax.block_until_ready(sine_cosine_transform(x2, scale))
    assert out2.shape == (3, 5, 2 * D)
    assert jnp.allclose(out2, ref_fn(x2, scale), atol=1e-5, rtol=1e-5)

    # Row-varying scale -> fused blocked-scale kernel (no second HBM pass).
    rscale = 0.5 + jax.random.uniform(k3, (B, S, 1), dtype=jnp.float32)
    out3 = jax.block_until_ready(sine_cosine_transform(x, rscale))
    assert jnp.allclose(out3, ref_fn(x, rscale), atol=1e-5, rtol=1e-5)

    # Lane-aligned D (D % 128 == 0) -> two aligned half-stores.
    x3 = jax.random.normal(k4, (2, 16, 128), dtype=jnp.float32)
    out4 = jax.block_until_ready(sine_cosine_transform(x3))
    assert jnp.allclose(out4, ref_fn(x3), atol=1e-5, rtol=1e-5)

    print("KERNEL_OK")
</pallas_src>

<mosaic_0001>
module attributes {stable_mosaic.version = 11 : i64} {
  func.func @_sincos_scaled_kernel(%arg0: i32, %arg1: memref<4x128xf32, #tpu.memory_space<vmem>>, %arg2: memref<1x256xf32, #tpu.memory_space<vmem>>, %arg3: memref<4x256xf32, #tpu.memory_space<vmem>>) attributes {dimension_semantics = [#tpu.dimension_semantics<parallel>], iteration_bounds = array<i64: 1>, scalar_prefetch = 0 : i64, scratch_operands = 0 : i64, tpu.core_type = #tpu.core_type<tc>, window_params = [{transform_indices = @transform_0, window_bounds = array<i64: 4, 128>}, {pipeline_mode = #tpu.pipeline_mode<synchronous>, transform_indices = @transform_1, window_bounds = array<i64: 1, 256>}, {transform_indices = @transform_2, window_bounds = array<i64: 4, 256>}]} {
    %c0 = arith.constant 0 : index
    %c0_0 = arith.constant 0 : index
    %0 = vector.load %arg1[%c0, %c0_0] : memref<4x128xf32, #tpu.memory_space<vmem>>, vector<4x128xf32>
    %cst = arith.constant 0.636619746 : f32
    %1 = vector.broadcast %cst : f32 to vector<4x128xf32>
    %2 = arith.mulf %0, %1 : vector<4x128xf32>
    %cst_1 = arith.constant 5.000000e-01 : f32
    %3 = vector.broadcast %cst_1 : f32 to vector<4x128xf32>
    %4 = arith.addf %2, %3 : vector<4x128xf32>
    %5 = math.floor %4 : vector<4x128xf32>
    %cst_2 = arith.constant 1.5703125 : f32
    %6 = vector.broadcast %cst_2 : f32 to vector<4x128xf32>
    %7 = arith.mulf %5, %6 : vector<4x128xf32>
    %8 = arith.subf %0, %7 : vector<4x128xf32>
    %cst_3 = arith.constant 4.83512878E-4 : f32
    %9 = vector.broadcast %cst_3 : f32 to vector<4x128xf32>
    %10 = arith.mulf %5, %9 : vector<4x128xf32>
    %11 = arith.subf %8, %10 : vector<4x128xf32>
    %cst_4 = arith.constant 3.13855708E-7 : f32
    %12 = vector.broadcast %cst_4 : f32 to vector<4x128xf32>
    %13 = arith.mulf %5, %12 : vector<4x128xf32>
    %14 = arith.subf %11, %13 : vector<4x128xf32>
    %cst_5 = arith.constant 6.07710063E-11 : f32
    %15 = vector.broadcast %cst_5 : f32 to vector<4x128xf32>
    %16 = arith.mulf %5, %15 : vector<4x128xf32>
    %17 = arith.subf %14, %16 : vector<4x128xf32>
    %18 = arith.mulf %17, %17 : vector<4x128xf32>
    %cst_6 = arith.constant -1.95152956E-4 : f32
    %19 = vector.broadcast %cst_6 : f32 to vector<4x128xf32>
    %20 = arith.mulf %19, %18 : vector<4x128xf32>
    %cst_7 = arith.constant 0.00833216123 : f32
    %21 = vector.broadcast %cst_7 : f32 to vector<4x128xf32>
    %22 = arith.addf %20, %21 : vector<4x128xf32>
    %23 = arith.mulf %22, %18 : vector<4x128xf32>
    %cst_8 = arith.constant -0.166666552 : f32
    %24 = vector.broadcast %cst_8 : f32 to vector<4x128xf32>
    %25 = arith.addf %23, %24 : vector<4x128xf32>
    %26 = arith.mulf %17, %18 : vector<4x128xf32>
    %27 = arith.mulf %26, %25 : vector<4x128xf32>
    %28 = arith.addf %17, %27 : vector<4x128xf32>
    %cst_9 = arith.constant 2.44331568E-5 : f32
    %29 = vector.broadcast %cst_9 : f32 to vector<4x128xf32>
    %30 = arith.mulf %29, %18 : vector<4x128xf32>
    %cst_10 = arith.constant -0.00138873165 : f32
    %31 = vector.broadcast %cst_10 : f32 to vector<4x128xf32>
    %32 = arith.addf %30, %31 : vector<4x128xf32>
    %33 = arith.mulf %32, %18 : vector<4x128xf32>
    %cst_11 = arith.constant 0.0416666456 : f32
    %34 = vector.broadcast %cst_11 : f32 to vector<4x128xf32>
    %35 = arith.addf %33, %34 : vector<4x128xf32>
    %cst_12 = arith.constant 5.000000e-01 : f32
    %36 = vector.broadcast %cst_12 : f32 to vector<4x128xf32>
    %37 = arith.mulf %36, %18 : vector<4x128xf32>
    %cst_13 = arith.constant 1.000000e+00 : f32
    %38 = vector.broadcast %cst_13 : f32 to vector<4x128xf32>
    %39 = arith.subf %38, %37 : vector<4x128xf32>
    %40 = arith.mulf %18, %18 : vector<4x128xf32>
    %41 = arith.mulf %40, %35 : vector<4x128xf32>
    %42 = arith.addf %39, %41 : vector<4x128xf32>
    %43 = arith.fptosi %5 : vector<4x128xf32> to vector<4x128xi32>
    %c1_i32 = arith.constant 1 : i32
    %44 = vector.broadcast %c1_i32 : i32 to vector<4x128xi32>
    %45 = arith.andi %43, %44 : vector<4x128xi32>
    %c0_i32 = arith.constant 0 : i32
    %46 = vector.broadcast %c0_i32 : i32 to vector<4x128xi32>
    %47 = arith.cmpi ne, %45, %46 : vector<4x128xi32>
    %c2_i32 = arith.constant 2 : i32
    %48 = vector.broadcast %c2_i32 : i32 to vector<4x128xi32>
    %49 = arith.andi %43, %48 : vector<4x128xi32>
    %c0_i32_14 = arith.constant 0 : i32
    %50 = vector.broadcast %c0_i32_14 : i32 to vector<4x128xi32>
    %51 = arith.cmpi ne, %49, %50 : vector<4x128xi32>
    %c1_i32_15 = arith.constant 1 : i32
    %52 = vector.broadcast %c1_i32_15 : i32 to vector<4x128xi32>
    %53 = arith.addi %43, %52 : vector<4x128xi32>
    %c2_i32_16 = arith.constant 2 : i32
    %54 = vector.broadcast %c2_i32_16 : i32 to vector<4x128xi32>
    %55 = arith.andi %53, %54 : vector<4x128xi32>
    %c0_i32_17 = arith.constant 0 : i32
    %56 = vector.broadcast %c0_i32_17 : i32 to vector<4x128xi32>
    %57 = arith.cmpi ne, %55, %56 : vector<4x128xi32>
    %58 = arith.select %47, %42, %28 : vector<4x128xi1>, vector<4x128xf32>
    %59 = arith.select %47, %28, %42 : vector<4x128xi1>, vector<4x128xf32>
    %cst_18 = arith.constant 0.000000e+00 : f32
    %60 = vector.broadcast %cst_18 : f32 to vector<4x128xf32>
    %61 = arith.subf %60, %58 : vector<4x128xf32>
    %62 = arith.select %51, %61, %58 : vector<4x128xi1>, vector<4x128xf32>
    %cst_19 = arith.constant 0.000000e+00 : f32
    %63 = vector.broadcast %cst_19 : f32 to vector<4x128xf32>
    %64 = arith.subf %63, %59 : vector<4x128xf32>
    %65 = arith.select %57, %64, %59 : vector<4x128xi1>, vector<4x128xf32>
    %66 = vector.extract_strided_slice %62 {offsets = [0, 0], sizes = [4, 32], strides = [1, 1]} : vector<4x128xf32> to vector<4x32xf32>
    %67 = vector.extract_strided_slice %65 {offsets = [0, 0], sizes = [4, 32], strides = [1, 1]} : vector<4x128xf32> to vector<4x32xf32>
    %68 = vector.extract_strided_slice %62 {offsets = [0, 32], sizes = [4, 32], strides = [1, 1]} : vector<4x128xf32> to vector<4x32xf32>
    %69 = vector.extract_strided_slice %65 {offsets = [0, 32], sizes = [4, 32], strides = [1, 1]} : vector<4x128xf32> to vector<4x32xf32>
    %70 = vector.extract_strided_slice %62 {offsets = [0, 64], sizes = [4, 32], strides = [1, 1]} : vector<4x128xf32> to vector<4x32xf32>
    %71 = vector.extract_strided_slice %65 {offsets = [0, 64], sizes = [4, 32], strides = [1, 1]} : vector<4x128xf32> to vector<4x32xf32>
    %72 = vector.extract_strided_slice %62 {offsets = [0, 96], sizes = [4, 32], strides = [1, 1]} : vector<4x128xf32> to vector<4x32xf32>
    %73 = vector.extract_strided_slice %65 {offsets = [0, 96], sizes = [4, 32], strides = [1, 1]} : vector<4x128xf32> to vector<4x32xf32>
    %74 = tpu.concatenate %66, %67, %68, %69, %70, %71, %72, %73 in 1 : vector<4x32xf32>, vector<4x32xf32>, vector<4x32xf32>, vector<4x32xf32>, vector<4x32xf32>, vector<4x32xf32>, vector<4x32xf32>, vector<4x32xf32> -> vector<4x256xf32>
    %c0_20 = arith.constant 0 : index
    %c0_21 = arith.constant 0 : index
    %75 = vector.load %arg2[%c0_20, %c0_21] : memref<1x256xf32, #tpu.memory_space<vmem>>, vector<1x256xf32>
    %76 = vector.broadcast %75 : vector<1x256xf32> to vector<4x256xf32>
    %77 = arith.mulf %74, %76 : vector<4x256xf32>
    %c0_22 = arith.constant 0 : index
    %c0_23 = arith.constant 0 : index
    %78 = vector.load %arg3[%c0_22, %c0_23] : memref<4x256xf32, #tpu.memory_space<vmem>>, vector<4x256xf32>
    tpu.vector_store %arg3[%c0_22, %c0_23], %77 {strides = array<i32>} : memref<4x256xf32, #tpu.memory_space<vmem>>, vector<4x256xf32>,
    return
  }
  func.func @transform_0(%arg0: i32) -> (i32, i32) {
    %c0_i32 = arith.constant 0 : i32
    %c0_i32_0 = arith.constant 0 : i32
    return %arg0, %c0_i32 : i32, i32
  }
  func.func @transform_1(%arg0: i32) -> (i32, i32) {
    %c0_i32 = arith.constant 0 : i32
    %c0_i32_0 = arith.constant 0 : i32
    %c0_i32_1 = arith.constant 0 : i32
    return %c0_i32, %c0_i32_0 : i32, i32
  }
  func.func @transform_2(%arg0: i32) -> (i32, i32) {
    %c0_i32 = arith.constant 0 : i32
    %c0_i32_0 = arith.constant 0 : i32
    return %arg0, %c0_i32 : i32, i32
  }
}

</mosaic_0001>

<bundles_post_ra>
// kernel: tpu_custom_call.1
= control target key start
LH: loop header
LB: loop body
LE: loop exit
PB: predicated region body
PF: predicated region fallthrough
CT: control target
= control target key end

     0   :  { %7 = vsyncpa [#allocation3], 0  ;;  %s247_s0 = inlined_call_operand.hbm [shape: f32[4,128], index: 0, kind: input, shape index: {}]   ;;  %s248_s1 = inlined_call_operand.hbm [shape: f32[1,256], index: 1, kind: input, shape index: {}]   ;;  %s249_s2 = inlined_call_operand.hbm [shape: f32[4,256], index: 2, kind: output, shape index: {}]  }
   0x1   :  { %8 = vsyncpa [#allocation6], 0 }
   0x2   :  { %9 = vsyncpa [#allocation4], 0  ;;  %s217_s9 = smov [#allocation2]   ;;  %s218_s11 = smov [#allocation5]  }
   0x3   :  { %s16_s10 = sshll.u32 %s217_s9, 4  ;;  %s26_s12 = sshll.u32 %s218_s11, 4  ;;  %s17_s10 = int_to_ptr.vmem [resolvable:$true] %s16_s10  ;;  %s27_s12 = int_to_ptr.vmem [resolvable:$true] %s26_s12 }
   0x4   :  { %s159_s13 = scalar_lea.vmem %s17_s10, 64  ;;  %p164_p1 = scmp.lt.s32.totalorder %s17_s10, %s17_s10 }
   0x5   :  { %p160_p0 = scmp.ne.s32.totalorder %s17_s10, %s159_s13  ;;  %p165_p2 = scmp.lt.s32.totalorder %s159_s13, %s159_s13 }
   0x7   :  { %p166_p3 = por %p165_p2, %p164_p1 }
   0x9   :  { %p167_p4 = pnand %p166_p3, %p160_p0 }
   0xb   :  { %170 = shalt.err (!%p167_p4)
}
   0xc   :  { %19 = dma.hbm_to_vmem [thread:$0]  %s247_s0, 64, %s17_s10, [#allocation3]  }
   0xd   :  { %s179_s16 = scalar_lea.vmem %s27_s12, 32  ;;  %p184_p6 = scmp.lt.s32.totalorder %s27_s12, %s27_s12 }
   0xe   :  { %p180_p5 = scmp.ne.s32.totalorder %s27_s12, %s179_s16  ;;  %p185_p7 = scmp.lt.s32.totalorder %s179_s16, %s179_s16 }
  0x10   :  { %p186_p8 = por %p185_p7, %p184_p6 }
  0x12   :  { %p187_p9 = pnand %p186_p8, %p180_p5 }
  0x14   :  { %190 = shalt.err (!%p187_p9)
}
  0x15   :  { %29 = dma.hbm_to_vmem [thread:$0]  %s248_s1, 32, %s27_s12, [#allocation6]  }
  0x16   :  { %211 = dma.done.wait [#allocation3], 64  }
  0x17   :  { %212 = vsyncadd [#allocation3], 4294967232 }
  0x18   :  { %213 = dma.done.wait [#allocation6], 32  }
  0x19   :  { %214 = vsyncadd [#allocation6], 4294967264  ;;  %v36_v0 = vld [vmem:[#allocation2] sm:$0xf]  ;;  %s219_s0 = smov 96   ;;  %s220_s1 = smov 32   ;;  %v110_v41 = vlaneseq }
  0x1a   :  { %v37_v1 = vmul.f32 0.63661975, %v36_v0  ;;  %s221_s19 = smov 64   ;;  %v108_v46 = vld [vmem:[#allocation5] sm:$0x3]  ;;  %vm99_vm3 = vcmask 261120  }
  0x1b   :  { %v111_v42 = vshrl.u32 %v110_v41, 7  ;;  %vm101_vm4 = vcmask 523264   ;;  %vm103_vm5 = vcmask 785408   ;;  %s222_s20 = smov [#allocation7]  }
  0x1c   :  { %v38_v2 = vadd.f32 0.5, %v37_v1  ;;  %s133_s21 = sshll.u32 %s222_s20, 4  ;;  %s134_s21 = int_to_ptr.vmem [resolvable:$true] %s133_s21 }
  0x1d   :  { %v112_v45 = vsub.s32 0, %v111_v42  ;;  %v116_v47 = vsub.s32 1, %v111_v42  ;;  %s191_s22 = scalar_lea.vmem %s134_s21, 128  ;;  %p196_p11 = scmp.lt.s32.totalorder %s134_s21, %s134_s21 }
  0x1e   :  { %v39_v3 = vfloor.f32 %v38_v2  ;;  %p192_p10 = scmp.ne.s32.totalorder %s134_s21, %s191_s22  ;;  %p197_p12 = scmp.lt.s32.totalorder %s191_s22, %s191_s22 }
  0x1f   :  { %v113_v50 = vrot.slane %v108_v46, %v112_v45  ;;  %v117_v52 = vrot.slane %v108_v46, %v116_v47 }
  0x20   :  { %v40_v4 = vmul.f32 1.5703125, %v39_v3  ;;  %v42_v5 = vmul.f32 0.00048351288, %v39_v3  ;;  %v44_v7 = vmul.f32 3.138557e-07, %v39_v3  ;;  %v46_v9 = vmul.f32 6.0771006e-11, %v39_v3  ;;  %p198_p13 = por %p197_p12, %p196_p11 }
  0x21   :  { %v143_v11 = vtrunc.f32 %v39_v3 }
  0x22   :  { %v41_v6 = vsub.f32 %v36_v0, %v40_v4  ;;  %p199_p0 = pnand %p198_p13, %p192_p10 }
  0x23   :  { %v144_v14 = vcvt.f32.s32 %v143_v11 }
  0x24   :  { %v43_v8 = vsub.f32 %v41_v6, %v42_v5 }
  0x25   :  { %v70_v20 = vadd.s32 1, %v144_v14  ;;  %v66_v25 = vand.u32 1, %v144_v14  ;;  %v68_v34 = vand.u32 2, %v144_v14 }
  0x26   :  { %v45_v10 = vsub.f32 %v43_v8, %v44_v7 }
  0x27   :  { %v71_v31 = vand.u32 2, %v70_v20  ;;  %vm67_vm0 = vcmp.ne.s32.totalorder %v66_v25, 0  ;;  %vm69_vm2 = vcmp.ne.s32.totalorder %v68_v34, 0 }
  0x28   :  { %v47_v12 = vsub.f32 %v45_v10, %v46_v9 }
  0x29   :  { %vm72_vm1 = vcmp.ne.s32.totalorder %v71_v31, 0 }
  0x2a   :  { %v48_v13 = vmul.f32 %v47_v12, %v47_v12 }
  0x2c   :  { %v49_v15 = vmul.f32 -0.00019515296, %v48_v13  ;;  %v56_v16 = vmul.f32 2.4433157e-05, %v48_v13  ;;  %v60_v19 = vmul.f32 0.5, %v48_v13  ;;  %v53_v22 = vmul.f32 %v48_v13, %v47_v12 }
  0x2d   :  { %v62_v24 = vmul.f32 %v48_v13, %v48_v13 }
  0x2e   :  { %v50_v17 = vadd.f32 0.008332161, %v49_v15  ;;  %v57_v18 = vadd.f32 -0.0013887316, %v56_v16  ;;  %v61_v28 = vsub.f32 1.0, %v60_v19 }
  0x30   :  { %v51_v21 = vmul.f32 %v50_v17, %v48_v13  ;;  %v58_v23 = vmul.f32 %v57_v18, %v48_v13 }
  0x32   :  { %v52_v26 = vadd.f32 -0.16666655, %v51_v21  ;;  %v59_v27 = vadd.f32 0.041666646, %v58_v23 }
  0x34   :  { %v54_v29 = vmul.f32 %v53_v22, %v52_v26  ;;  %v63_v30 = vmul.f32 %v62_v24, %v59_v27 }
  0x36   :  { %v55_v32 = vadd.f32 %v54_v29, %v47_v12  ;;  %v64_v33 = vadd.f32 %v63_v30, %v61_v28 }
  0x38   :  { %v74_v35 = vsel %vm67_vm0, %v55_v32, %v64_v33  ;;  %v73_v36 = vsel %vm67_vm0, %v64_v33, %v55_v32 }
  0x39   :  { %v77_v37 = vsub.f32 0.0, %v74_v35  ;;  %v75_v38 = vsub.f32 0.0, %v73_v36 }
  0x3b   :  { %v78_v39 = vsel %vm72_vm1, %v77_v37, %v74_v35  ;;  %v76_v40 = vsel %vm69_vm2, %v75_v38, %v73_v36 }
  0x3c   :  { %93 = vrot.lane.b32.xlu1 %v78_v39, %s219_s0  ;;  %80 = vrot.lane.b32.xlu0 %v78_v39, %s220_s1 }
  0x40   :  { %84 = vrot.lane.b32.xlu1 %v76_v40, %s220_s1  ;;  %90 = vrot.lane.b32.xlu0 %v76_v40, %s221_s19 }
  0x44   :  { %87 = vrot.lane.b32.xlu1 %v78_v39, %s221_s19  ;;  %96 = vrot.lane.b32.xlu0 %v76_v40, %s219_s0 }
  0xae   :  { %v94_v43 = vpop.permute.xlu1 %93  ;;  %v81_v44 = vpop.permute.xlu0 %80 }
  0xaf   :  { %v100_v51 = vsel %vm99_vm3, %v76_v40, %v81_v44 }
  0xb2   :  { %v85_v48 = vpop.permute.xlu1 %84  ;;  %v91_v49 = vpop.permute.xlu0 %90 }
  0xb3   :  { %v102_v53 = vsel %vm101_vm4, %v100_v51, %v85_v48  ;;  %v105_v54 = vsel %vm99_vm3, %v91_v49, %v94_v43 }
  0xb6   :  { %v88_v55 = vpop.permute.xlu1 %87  ;;  %v97_v56 = vpop.permute.xlu0 %96 }
  0xb7   :  { %v104_v57 = vsel %vm103_vm5, %v102_v53, %v88_v55  ;;  %v106_v58 = vsel %vm101_vm4, %v105_v54, %v97_v56 }
  0xb8   :  { %v120_v59 = vmul.f32 %v113_v50, %v104_v57  ;;  %v107_v60 = vsel %vm103_vm5, %v106_v58, %v78_v39 }
  0xb9   :  { %v121_v61 = vmul.f32 %v117_v52, %v107_v60 }
  0xbb   :  { %v124_v62 = vcombine.low %v120_v59, %v121_v61 }
  0xbd   :  { %126 = vst [vmem:[#allocation7] sm:$0xff] %v124_v62 }
  0xbe   :  { %202 = shalt.err (!%p199_p0)
}
  0xbf   :  { %136 = dma.vmem_to_hbm [thread:$0]  %s134_s21, 128, %s249_s2, [#allocation4]  }
  0xc0   :  { %215 = dma.done.wait [#allocation4], 128  }
  0xc1   :  { %216 = vsyncadd [#allocation4], 4294967168 }
  0xc2   :  { %140 = vsyncpa [#allocation3], 1 }
  0xc3   :  { %141 = vsyncpa [#allocation6], 1 }
  0xc4   :  { %142 = vsyncpa [#allocation4], 1 }

</bundles_post_ra>
